<compile_context>
chip_gen: v5e
topology: v5e:2x2
jax: 0.10.0
libtpu: 0.0.40
codegen_flags: <defaults>
</compile_context>

<pallas_src>
import functools

import jax
import jax.numpy as jnp
import numpy as np
from jax.experimental import pallas as pl
from jax.experimental.pallas import tpu as pltpu

BN_EPS = 1e-5
VMEM_LIMIT_BYTES = 32 * 1024 * 1024   # explicit budget; safe headroom on v7x (64 MiB VMEM)


# ----------------------------- Pallas kernels -----------------------------------------

def _conv_stats_kernel(xp_ref, w_ref, stats_ref):
    """Pass 1: relu -> (C_out,K)x(K,tile) matmul -> accumulate per-channel sum / sumsq."""
    first = (pl.program_id(0) == 0) & (pl.program_id(1) == 0)

    @pl.when(first)
    def _():
        stats_ref[...] = jnp.zeros_like(stats_ref)

    xp = jnp.maximum(xp_ref[0], 0.0)                                      # (K, tile)  relu
    conv = jnp.dot(w_ref[...], xp, preferred_element_type=jnp.float32)    # (C_out, tile)
    stats_ref[:, 0:1] += jnp.sum(conv, axis=1, keepdims=True)             # sum
    stats_ref[:, 1:2] += jnp.sum(conv * conv, axis=1, keepdims=True)      # sum of squares


def _conv_bn_kernel(xp_ref, w_ref, scale_ref, shift_ref, o_ref):
    """Pass 2: relu -> matmul -> folded batch-norm affine, lane-dense store."""
    xp = jnp.maximum(xp_ref[0], 0.0)                                      # (K, tile)
    conv = jnp.dot(w_ref[...], xp, preferred_element_type=jnp.float32)    # (C_out, tile)
    o_ref[0] = (conv * scale_ref[...] + shift_ref[...]).astype(o_ref.dtype)


# ----------------------------- Wrapper --------------------------------------------------

def _pick_tile(p_hw):
    """Largest pixel tile (multiple of 128) that divides p_hw; else one full block."""
    for t in (2048, 1024, 512, 256, 128):
        if p_hw % t == 0:
            return t
    # TODO(synk): ragged pixel counts (not a multiple of 128) fall back to a single
    # full-width block; a pad+mask path would be needed for very large odd sizes.
    return p_hw


def _extract_patches(x, kh, kw, stride, padding):
    """x (N,C,H,W) -> patches (N, C*kh*kw, H_out*W_out), channel-major to match OIHW weights."""
    n, c, h, w = x.shape
    if kh == 1 and kw == 1 and stride == 1 and padding == 0:
        return x.reshape(n, c, h * w), h, w            # free: pure reshape, no data movement
    if padding:
        x = jnp.pad(x, ((0, 0), (0, 0), (padding, padding), (padding, padding)))
    hp, wp = x.shape[2], x.shape[3]
    h_out = (hp - kh) // stride + 1
    w_out = (wp - kw) // stride + 1
    cols = []
    for ky in range(kh):
        for kx in range(kw):
            sl = x[:, :, ky:ky + stride * h_out:stride, kx:kx + stride * w_out:stride]
            cols.append(sl.reshape(n, c, h_out * w_out))
    patches = jnp.stack(cols, axis=2).reshape(n, c * kh * kw, h_out * w_out)
    return patches, h_out, w_out


@functools.partial(jax.jit, static_argnames=("kernel_size", "stride", "padding"))
def relu_conv_bn(x, w, gamma, beta, *, kernel_size, stride, padding):
    """ReLU -> Conv2d(no bias) -> BatchNorm2d(train mode, affine).  x: (N,C_in,H,W) f32."""
    n, c_in, _, _ = x.shape
    c_out = w.shape[0]
    kh = kw = kernel_size
    # TODO(synk): conv bias path (affine=False => bias=True) and BN running-stat updates
    # are not implemented; this matches the module's default affine=True forward math.

    patches, h_out, w_out = _extract_patches(x, kh, kw, stride, padding)
    k = c_in * kh * kw
    p_hw = h_out * w_out
    tile = _pick_tile(p_hw)
    n_tiles = p_hw // tile

    wm = w.reshape(c_out, k).astype(jnp.float32)

    # ---- pass 1: per-channel sum / sum-of-squares of the conv output (streamed) ----
    stats = pl.pallas_call(
        _conv_stats_kernel,
        out_shape=jax.ShapeDtypeStruct((c_out, 2), jnp.float32),
        grid=(n, n_tiles),
        in_specs=[
            pl.BlockSpec((1, k, tile), lambda i, t: (i, 0, t)),
            pl.BlockSpec((c_out, k), lambda i, t: (0, 0)),
        ],
        out_specs=pl.BlockSpec((c_out, 2), lambda i, t: (0, 0)),
        compiler_params=pltpu.CompilerParams(
            dimension_semantics=("arbitrary", "arbitrary"),   # global reduction
            vmem_limit_bytes=VMEM_LIMIT_BYTES),
    )(patches, wm)

    # Tiny per-channel glue: fold BN into scale/shift (single-pass sum/sumsq stats).
    count = jnp.float32(n * p_hw)
    mean = stats[:, 0] / count
    var = jnp.maximum(stats[:, 1] / count - mean * mean, 0.0)   # biased variance
    inv = jax.lax.rsqrt(var + BN_EPS)
    scale = (gamma * inv).reshape(c_out, 1).astype(jnp.float32)
    shift = (beta - mean * gamma * inv).reshape(c_out, 1).astype(jnp.float32)

    # ---- pass 2: recompute relu+matmul, apply folded BN, lane-dense writes ----
    out = pl.pallas_call(
        _conv_bn_kernel,
        out_shape=jax.ShapeDtypeStruct((n, c_out, p_hw), jnp.float32),
        grid=(n, n_tiles),
        in_specs=[
            pl.BlockSpec((1, k, tile), lambda i, t: (i, 0, t)),
            pl.BlockSpec((c_out, k), lambda i, t: (0, 0)),
            pl.BlockSpec((c_out, 1), lambda i, t: (0, 0)),
            pl.BlockSpec((c_out, 1), lambda i, t: (0, 0)),
        ],
        out_specs=pl.BlockSpec((1, c_out, tile), lambda i, t: (i, 0, t)),
        compiler_params=pltpu.CompilerParams(
            dimension_semantics=("parallel", "parallel"),   # tiles independent; shards on v7x
            vmem_limit_bytes=VMEM_LIMIT_BYTES),
    )(patches, wm, scale, shift)

    return out.reshape(n, c_out, h_out, w_out)


# ----------------------------- Reference + demo ----------------------------------------

def _reference(x, w, gamma, beta, stride, padding):
    xr = jnp.maximum(x, 0.0)
    conv = jax.lax.conv_general_dilated(
        xr, w, window_strides=(stride, stride),
        padding=[(padding, padding), (padding, padding)],
        dimension_numbers=("NCHW", "OIHW", "NCHW"))
    mean = jnp.mean(conv, axis=(0, 2, 3), keepdims=True)
    var = jnp.mean((conv - mean) ** 2, axis=(0, 2, 3), keepdims=True)
    g = gamma.reshape(1, -1, 1, 1)
    b = beta.reshape(1, -1, 1, 1)
    return (conv - mean) * jax.lax.rsqrt(var + BN_EPS) * g + b


if __name__ == "__main__":
    key = jax.random.PRNGKey(0)
    kx, kw1, kw3, kg, kb = jax.random.split(key, 5)

    N, C_in, H, W = 2, 4, 16, 16
    C_out = 8
    x = jax.random.normal(kx, (N, C_in, H, W), dtype=jnp.float32)

    # Case 1: the common DARTS preprocessing config (1x1 conv, stride 1, pad 0),
    # BN affine params at PyTorch defaults (gamma=1, beta=0).
    w1 = 0.1 * jax.random.normal(kw1, (C_out, C_in, 1, 1), dtype=jnp.float32)
    gamma1 = jnp.ones((C_out,), jnp.float32)
    beta1 = jnp.zeros((C_out,), jnp.float32)
    y1 = relu_conv_bn(x, w1, gamma1, beta1, kernel_size=1, stride=1, padding=0)
    jax.block_until_ready(y1)
    assert y1.shape == (N, C_out, H, W), y1.shape
    r1 = _reference(x, w1, gamma1, beta1, 1, 0)
    np.testing.assert_allclose(np.asarray(y1), np.asarray(r1), rtol=1e-2, atol=1e-2)

    # Case 2: general path (3x3 conv, stride 1, pad 1) with non-trivial gamma/beta.
    w3 = 0.1 * jax.random.normal(kw3, (C_out, C_in, 3, 3), dtype=jnp.float32)
    gamma3 = 1.0 + 0.1 * jax.random.normal(kg, (C_out,), dtype=jnp.float32)
    beta3 = 0.1 * jax.random.normal(kb, (C_out,), dtype=jnp.float32)
    y3 = relu_conv_bn(x, w3, gamma3, beta3, kernel_size=3, stride=1, padding=1)
    jax.block_until_ready(y3)
    assert y3.shape == (N, C_out, H, W), y3.shape
    r3 = _reference(x, w3, gamma3, beta3, 1, 1)
    np.testing.assert_allclose(np.asarray(y3), np.asarray(r3), rtol=1e-2, atol=1e-2)

    print("KERNEL_OK")
</pallas_src>

<mosaic_0001>
module attributes {stable_mosaic.version = 11 : i64} {
  func.func @_conv_stats_kernel(%arg0: i32, %arg1: i32, %arg2: memref<1x4x256xf32, #tpu.memory_space<vmem>>, %arg3: memref<8x4xf32, #tpu.memory_space<vmem>>, %arg4: memref<8x2xf32, #tpu.memory_space<vmem>>) attributes {dimension_semantics = [#tpu.dimension_semantics<arbitrary>, #tpu.dimension_semantics<arbitrary>], iteration_bounds = array<i64: 2, 1>, scalar_prefetch = 0 : i64, scratch_operands = 0 : i64, tpu.core_type = #tpu.core_type<tc>, window_params = [{transform_indices = @transform_0, window_bounds = array<i64: 1, 4, 256>}, {pipeline_mode = #tpu.pipeline_mode<synchronous>, transform_indices = @transform_1, window_bounds = array<i64: 8, 4>}, {pipeline_mode = #tpu.pipeline_mode<synchronous>, transform_indices = @transform_2, window_bounds = array<i64: 8, 2>}]} {
    %c0_i32 = arith.constant 0 : i32
    %0 = arith.cmpi eq, %arg0, %c0_i32 : i32
    %c0_i32_0 = arith.constant 0 : i32
    %1 = arith.cmpi eq, %arg1, %c0_i32_0 : i32
    %2 = arith.andi %0, %1 : i1
    %3 = arith.extui %2 : i1 to i32
    %c0_i32_1 = arith.constant 0 : i32
    %4 = arith.cmpi ne, %3, %c0_i32_1 : i32
    scf.if %4 {
      %cst_16 = arith.constant 0.000000e+00 : f32
      %22 = vector.broadcast %cst_16 : f32 to vector<8x2xf32>
      %c0_17 = arith.constant 0 : index
      %c0_18 = arith.constant 0 : index
      %23 = vector.load %arg4[%c0_17, %c0_18] : memref<8x2xf32, #tpu.memory_space<vmem>>, vector<8x2xf32>
      tpu.vector_store %arg4[%c0_17, %c0_18], %22 {strides = array<i32>} : memref<8x2xf32, #tpu.memory_space<vmem>>, vector<8x2xf32>,
    } else {
    }
    %c0 = arith.constant 0 : index
    %c0_2 = arith.constant 0 : index
    %c0_3 = arith.constant 0 : index
    %5 = vector.load %arg2[%c0, %c0_2, %c0_3] : memref<1x4x256xf32, #tpu.memory_space<vmem>>, vector<1x4x256xf32>
    %6 = vector.shape_cast %5 : vector<1x4x256xf32> to vector<4x256xf32>
    %cst = arith.constant 0.000000e+00 : f32
    %7 = vector.broadcast %cst : f32 to vector<4x256xf32>
    %8 = arith.maximumf %6, %7 : vector<4x256xf32>
    %c0_4 = arith.constant 0 : index
    %c0_5 = arith.constant 0 : index
    %9 = vector.load %arg3[%c0_4, %c0_5] : memref<8x4xf32, #tpu.memory_space<vmem>>, vector<8x4xf32>
    %cst_6 = arith.constant dense<0.000000e+00> : vector<8x256xf32>
    %10 = tpu.matmul %9, %8, %cst_6 {dimension_numbers = #tpu.dot_dimension_numbers<[1], [0], [0], [1], [0, 0, 1, 1], [], []>} : vector<8x4xf32>, vector<4x256xf32>, vector<8x256xf32> -> vector<8x256xf32>
    %c0_7 = arith.constant 0 : index
    %c0_8 = arith.constant 0 : index
    %11 = vector.load %arg4[%c0_7, %c0_8] : memref<8x2xf32, #tpu.memory_space<vmem>>, vector<8x1xf32>
    %cst_9 = arith.constant dense<0.000000e+00> : vector<8xf32>
    %12 = vector.multi_reduction <add>, %10, %cst_9 [1] : vector<8x256xf32> to vector<8xf32>
    %13 = vector.shape_cast %12 : vector<8xf32> to vector<8x1xf32>
    %14 = arith.addf %11, %13 : vector<8x1xf32>
    %c0_10 = arith.constant 0 : index
    %c0_11 = arith.constant 0 : index
    %15 = vector.load %arg4[%c0_10, %c0_11] : memref<8x2xf32, #tpu.memory_space<vmem>>, vector<8x1xf32>
    tpu.vector_store %arg4[%c0_10, %c0_11], %14 {strides = array<i32>} : memref<8x2xf32, #tpu.memory_space<vmem>>, vector<8x1xf32>,
    %c0_12 = arith.constant 0 : index
    %c1 = arith.constant 1 : index
    %16 = vector.load %arg4[%c0_12, %c1] : memref<8x2xf32, #tpu.memory_space<vmem>>, vector<8x1xf32>
    %17 = arith.mulf %10, %10 : vector<8x256xf32>
    %cst_13 = arith.constant dense<0.000000e+00> : vector<8xf32>
    %18 = vector.multi_reduction <add>, %17, %cst_13 [1] : vector<8x256xf32> to vector<8xf32>
    %19 = vector.shape_cast %18 : vector<8xf32> to vector<8x1xf32>
    %20 = arith.addf %16, %19 : vector<8x1xf32>
    %c0_14 = arith.constant 0 : index
    %c1_15 = arith.constant 1 : index
    %21 = vector.load %arg4[%c0_14, %c1_15] : memref<8x2xf32, #tpu.memory_space<vmem>>, vector<8x1xf32>
    tpu.vector_store %arg4[%c0_14, %c1_15], %20 {strides = array<i32>} : memref<8x2xf32, #tpu.memory_space<vmem>>, vector<8x1xf32>,
    return
  }
  func.func @transform_0(%arg0: i32, %arg1: i32) -> (i32, i32, i32) {
    %c0_i32 = arith.constant 0 : i32
    %c0_i32_0 = arith.constant 0 : i32
    return %arg0, %c0_i32, %arg1 : i32, i32, i32
  }
  func.func @transform_1(%arg0: i32, %arg1: i32) -> (i32, i32) {
    %c0_i32 = arith.constant 0 : i32
    %c0_i32_0 = arith.constant 0 : i32
    %c0_i32_1 = arith.constant 0 : i32
    return %c0_i32, %c0_i32_0 : i32, i32
  }
  func.func @transform_2(%arg0: i32, %arg1: i32) -> (i32, i32) {
    %c0_i32 = arith.constant 0 : i32
    %c0_i32_0 = arith.constant 0 : i32
    %c0_i32_1 = arith.constant 0 : i32
    return %c0_i32, %c0_i32_0 : i32, i32
  }
}

module attributes {stable_mosaic.version = 11 : i64} {
  func.func @_conv_bn_kernel(%arg0: i32, %arg1: i32, %arg2: memref<1x4x256xf32, #tpu.memory_space<vmem>>, %arg3: memref<8x4xf32, #tpu.memory_space<vmem>>, %arg4: memref<8x1xf32, #tpu.memory_space<vmem>>, %arg5: memref<8x1xf32, #tpu.memory_space<vmem>>, %arg6: memref<1x8x256xf32, #tpu.memory_space<vmem>>) attributes {dimension_semantics = [#tpu.dimension_semantics<parallel>, #tpu.dimension_semantics<parallel>], iteration_bounds = array<i64: 2, 1>, scalar_prefetch = 0 : i64, scratch_operands = 0 : i64, tpu.core_type = #tpu.core_type<tc>, window_params = [{transform_indices = @transform_0, window_bounds = array<i64: 1, 4, 256>}, {pipeline_mode = #tpu.pipeline_mode<synchronous>, transform_indices = @transform_1, window_bounds = array<i64: 8, 4>}, {pipeline_mode = #tpu.pipeline_mode<synchronous>, transform_indices = @transform_2, window_bounds = array<i64: 8, 1>}, {pipeline_mode = #tpu.pipeline_mode<synchronous>, transform_indices = @transform_3, window_bounds = array<i64: 8, 1>}, {transform_indices = @transform_4, window_bounds = array<i64: 1, 8, 256>}]} {
    %c0 = arith.constant 0 : index
    %c0_0 = arith.constant 0 : index
    %c0_1 = arith.constant 0 : index
    %0 = vector.load %arg2[%c0, %c0_0, %c0_1] : memref<1x4x256xf32, #tpu.memory_space<vmem>>, vector<1x4x256xf32>
    %1 = vector.shape_cast %0 : vector<1x4x256xf32> to vector<4x256xf32>
    %cst = arith.constant 0.000000e+00 : f32
    %2 = vector.broadcast %cst : f32 to vector<4x256xf32>
    %3 = arith.maximumf %1, %2 : vector<4x256xf32>
    %c0_2 = arith.constant 0 : index
    %c0_3 = arith.constant 0 : index
    %4 = vector.load %arg3[%c0_2, %c0_3] : memref<8x4xf32, #tpu.memory_space<vmem>>, vector<8x4xf32>
    %cst_4 = arith.constant dense<0.000000e+00> : vector<8x256xf32>
    %5 = tpu.matmul %4, %3, %cst_4 {dimension_numbers = #tpu.dot_dimension_numbers<[1], [0], [0], [1], [0, 0, 1, 1], [], []>} : vector<8x4xf32>, vector<4x256xf32>, vector<8x256xf32> -> vector<8x256xf32>
    %c0_5 = arith.constant 0 : index
    %c0_6 = arith.constant 0 : index
    %6 = vector.load %arg4[%c0_5, %c0_6] : memref<8x1xf32, #tpu.memory_space<vmem>>, vector<8x1xf32>
    %7 = vector.broadcast %6 : vector<8x1xf32> to vector<8x256xf32>
    %8 = arith.mulf %5, %7 : vector<8x256xf32>
    %c0_7 = arith.constant 0 : index
    %c0_8 = arith.constant 0 : index
    %9 = vector.load %arg5[%c0_7, %c0_8] : memref<8x1xf32, #tpu.memory_space<vmem>>, vector<8x1xf32>
    %10 = vector.broadcast %9 : vector<8x1xf32> to vector<8x256xf32>
    %11 = arith.addf %8, %10 : vector<8x256xf32>
    %c0_9 = arith.constant 0 : index
    %c0_10 = arith.constant 0 : index
    %c0_11 = arith.constant 0 : index
    %12 = vector.load %arg6[%c0_9, %c0_10, %c0_11] : memref<1x8x256xf32, #tpu.memory_space<vmem>>, vector<1x8x256xf32>
    %13 = vector.shape_cast %12 : vector<1x8x256xf32> to vector<8x256xf32>
    %14 = vector.shape_cast %11 : vector<8x256xf32> to vector<1x8x256xf32>
    tpu.vector_store %arg6[%c0_9, %c0_10, %c0_11], %14 {strides = array<i32>} : memref<1x8x256xf32, #tpu.memory_space<vmem>>, vector<1x8x256xf32>,
    return
  }
  func.func @transform_0(%arg0: i32, %arg1: i32) -> (i32, i32, i32) {
    %c0_i32 = arith.constant 0 : i32
    %c0_i32_0 = arith.constant 0 : i32
    return %arg0, %c0_i32, %arg1 : i32, i32, i32
  }
  func.func @transform_1(%arg0: i32, %arg1: i32) -> (i32, i32) {
    %c0_i32 = arith.constant 0 : i32
    %c0_i32_0 = arith.constant 0 : i32
    %c0_i32_1 = arith.constant 0 : i32
    return %c0_i32, %c0_i32_0 : i32, i32
  }
  func.func @transform_2(%arg0: i32, %arg1: i32) -> (i32, i32) {
    %c0_i32 = arith.constant 0 : i32
    %c0_i32_0 = arith.constant 0 : i32
    %c0_i32_1 = arith.constant 0 : i32
    return %c0_i32, %c0_i32_0 : i32, i32
  }
  func.func @transform_3(%arg0: i32, %arg1: i32) -> (i32, i32) {
    %c0_i32 = arith.constant 0 : i32
    %c0_i32_0 = arith.constant 0 : i32
    %c0_i32_1 = arith.constant 0 : i32
    return %c0_i32, %c0_i32_0 : i32, i32
  }
  func.func @transform_4(%arg0: i32, %arg1: i32) -> (i32, i32, i32) {
    %c0_i32 = arith.constant 0 : i32
    %c0_i32_0 = arith.constant 0 : i32
    return %arg0, %c0_i32, %arg1 : i32, i32, i32
  }
}

</mosaic_0001>

<bundles_post_ra>
// kernel: relu_conv_bn.3
= control target key start
LH: loop header
LB: loop body
LE: loop exit
PB: predicated region body
PF: predicated region fallthrough
CT: control target
= control target key end

     0   :  { %s491_s15 = smov 0   ;;  %s493_s16 = smov 0   ;;  %s533_s0 = inlined_call_operand.vmem [shape: f32[2,4,256], index: 0, kind: input, shape index: {}]   ;;  %s534_s1 = inlined_call_operand.vmem [shape: f32[8,4], index: 1, kind: input, shape index: {}]   ;;  %s535_s2 = inlined_call_operand.vmem [shape: f32[8,1], index: 2, kind: input, shape index: {}]   ;;  %s536_s3 = inlined_call_operand.vmem [shape: f32[8,1], index: 3, kind: input, shape index: {}]   ;;  %s537_s4 = inlined_call_operand.vmem [shape: f32[2,8,256], index: 4, kind: output, shape index: {}]  }
   0x1   :  { %s495_s17 = smov 0  }
   0x2 LB: > { %s26_s18 = sadd.s32 1, %s459_s16  ;;  %p402_p0 = scmp.ge.s32.totalorder %s463_s17, 1  ;;  %s463_s17 = sphi %s495_s17, %s14_s17   ;;  %s459_s16 = sphi %s493_s16, %s539_s16   ;;  %s455_s15 = sphi %s491_s15, %s538_s15  }
   0x3   : > { %p28_p1 = scmp.ge.s32.totalorder %s26_s18, 2  ;;  %p183_p2 = scmp.lt.s32.totalorder %s463_s17, 3 }
   0x5   : > { %s541_s18 = smov (%p28_p1, %s26_s18), 0  ;;  %p184_p3 = pnand %p402_p0, %p183_p2 }
   0x6   : > { %p218_p4 = scmp.lt.s32.totalorder (!%p184_p3), %s455_s15, 1 }
   0x7   : > { %187 = sbr.rel (%p184_p3) target bundleno = 159 (0x9f), region = 36 }
   0xc   : > { %v293_v0 = vld [vmem:[%s535_s2] sm:$0xff]  ;;  %v465_v1 = vmov 0   ;;  %s543_s15 = smov (!%p218_p4, %s455_s15), 1  ;;  %vm248_vm0 = vcmask 1043456   ;;  %vm244_vm1 = vcmask 31744  }
   0xd   : > { %440 = vset.pattern.permute.xlu0 %v465_v1  ;;  %s413_s21 = sshll.u32 %s543_s15, 3  ;;  %v301_v4 = vld [vmem:[%s536_s3] sm:$0xff]  ;;  %s414_s29 = sshll.u32 %s543_s15, 4 }
   0xe   : > { %296 = vperm.xlu0 %440, %v293_v0   ;;  %s225_s24 = scalar_lea.vmem %s533_s0, %s413_s21  ;;  %v239_v5 = vld [vmem:[%s534_s1] sm:$0xff]  ;;  %s235_s6 = scalar_lea.vmem %s537_s4, %s414_s29 }
   0xf   : > { %v237_v2 = vld [vmem:[%s225_s24] sm:$0xff] }
  0x10   : > { %v238_v3 = vmax.f32 %v237_v2, 0.0 }
  0x12   : > { %241 = vst [vmem:[#allocation1] ss:$2 sm:$0xff] %v238_v3 }
  0x16   : > { %304 = vperm.xlu0 %440, %v301_v4  }
  0x19   : > { %v242_v6 = vld.sshfl [vmem:[#allocation1] sm:$0xff pattern:$0x75316420]  ;;  %v243_v7 = vld.sshfl [vmem:[#allocation1 + $0x8] sm:$0xff pattern:$0x75316420] }
  0x1a   : > { %407 = vmatpush.msk.msra.mxu0 %vm248_vm0, %v242_v6  ;;  %409 = vmatpush.msk.msra.mxu1 %vm248_vm0, %v243_v7 }
  0x1b   : > { %408 = vmatmul.msk.f32.vlgmr.msra.gmra.mxu0 %vm244_vm1, %v239_v5  ;;  %410 = vmatmul.msk.f32.vlgmr.msra.gmra.mxu1 %vm244_vm1, %v239_v5 }
  0x80   : > { %v297_v8 = vpop.permute.xlu0 %296 }
  0x88   : > { %v305_v13 = vpop.permute.xlu0 %304 }
  0x98   : > { %v270_v9 = vpop.f32.mrf.mxu0  ;;  %v290_v10 = vpop.f32.mrf.mxu1 }
  0x99   : > { %v299_v11 = vmul.f32 %v297_v8, %v270_v9  ;;  %v300_v12 = vmul.f32 %v297_v8, %v290_v10 }
  0x9b   : > { %v307_v14 = vadd.f32 %v305_v13, %v299_v11  ;;  %v308_v15 = vadd.f32 %v305_v13, %v300_v12 }
  0x9d   : > { %309 = vst [vmem:[%s235_s6] sm:$0xff] %v307_v14 }
  0x9e   : > { %310 = vst [vmem:[%s235_s6 + $0x8] sm:$0xff] %v308_v15 }
  0x9f PF: > { %s14_s17 = sadd.s32 1, %s463_s17   ;;  %s538_s15 = smov %s459_s16 }
  0xa0   : > { %p11_p5 = scmp.ge.s32.totalorder %s14_s17, 4   ;;  %s539_s16 = smov %s541_s18 }
  0xa2   :  { %13 = sbr.rel (!%p11_p5) target bundleno = 2 (0x2), region = 66 }

// kernel: relu_conv_bn.2
= control target key start
LH: loop header
LB: loop body
LE: loop exit
PB: predicated region body
PF: predicated region fallthrough
CT: control target
= control target key end

     0   :  { %s359_s9 = smov 0   ;;  %s361_s10 = smov 0   ;;  %s407_s0 = inlined_call_operand.vmem [shape: f32[2,4,256], index: 0, kind: input, shape index: {}]   ;;  %s408_s1 = inlined_call_operand.vmem [shape: f32[8,4], index: 1, kind: input, shape index: {}]   ;;  %s409_s2 = inlined_call_operand.vmem [shape: f32[8,2], index: 2, kind: output, shape index: {}]  }
   0x1   :  { %s363_s11 = smov 0  }
   0x2 LB: > { %s24_s12 = sadd.s32 1, %s337_s10  ;;  %p282_p0 = scmp.ge.s32.totalorder %s341_s11, 1  ;;  %s341_s11 = sphi %s363_s11, %s12_s11   ;;  %s337_s10 = sphi %s361_s10, %s411_s10   ;;  %s333_s9 = sphi %s359_s9, %s410_s9  }
   0x3   : > { %p26_p1 = scmp.ge.s32.totalorder %s24_s12, 2  ;;  %p126_p2 = scmp.lt.s32.totalorder %s341_s11, 3 }
   0x5   : > { %s413_s12 = smov (%p26_p1, %s24_s12), 0  ;;  %p127_p3 = pnand %p282_p0, %p126_p2 }
   0x6   : > { %p148_p4 = scmp.lt.s32.totalorder (!%p127_p3), %s333_s9, 1  ;;  %p157_p5 = scmp.eq.s32.totalorder (!%p127_p3), %s333_s9, 0 }
   0x7   : > { %130 = sbr.rel (%p127_p3) target bundleno = 286 (0x11e), region = 28 }
   0xc   : > { %s415_s9 = smov (!%p148_p4, %s333_s9), 1  ;;  %162 = sbr.rel (!%p157_p5) target bundleno = 17 (0x11), region = 32  ;;  %vm163_vm0 = vcmask (%p157_p5), 15360   ;;  %v343_v0 = vmov (%p157_p5), 0.0  }
   0xd   : > { %s292_s13 = sshll.u32 %s415_s9, 3  ;;  %164 = vst.msk [vmem:[%s409_s2] sm:$0xff] (%p157_p5), %vm163_vm0, %v343_v0 }
   0xe   : > { %s155_s16 = scalar_lea.vmem %s407_s0, %s292_s13 }
  0x11 PF: > { %v165_v1 = vld [vmem:[%s155_s16] sm:$0xff]  ;;  %vm176_vm1 = vcmask 1043456   ;;  %vm172_vm2 = vcmask 31744   ;;  %vm226_vm3 = vcmask 7168   ;;  %vm235_vm4 = vcmask 15368  }
  0x12   : > { %v166_v2 = vmax.f32 %v165_v1, 0.0  ;;  %v167_v3 = vld [vmem:[%s408_s1] sm:$0xff] }
  0x14   : > { %169 = vst [vmem:[#allocation1] ss:$2 sm:$0xff] %v166_v2  ;;  %v221_v12 = vld [vmem:[%s409_s2] sm:$0xff] }
  0x1b   : > { %v170_v4 = vld.sshfl [vmem:[#allocation1] sm:$0xff pattern:$0x75316420]  ;;  %v171_v5 = vld.sshfl [vmem:[#allocation1 + $0x8] sm:$0xff pattern:$0x75316420] }
  0x1c   : > { %286 = vmatpush.msk.msra.mxu0 %vm176_vm1, %v170_v4  ;;  %288 = vmatpush.msk.msra.mxu1 %vm176_vm1, %v171_v5 }
  0x1d   : > { %287 = vmatmul.msk.f32.vlgmr.msra.gmra.mxu0 %vm172_vm2, %v167_v3  ;;  %289 = vmatmul.msk.f32.vlgmr.msra.gmra.mxu1 %vm172_vm2, %v167_v3 }
  0x9a   : > { %v198_v6 = vpop.f32.mrf.mxu0  ;;  %v218_v7 = vpop.f32.mrf.mxu1 }
  0x9b   : > { %v222_v8 = vadd.f32 %v218_v7, %v198_v6  ;;  %v229_v9 = vmul.f32 %v198_v6, %v198_v6  ;;  %v230_v10 = vmul.f32 %v218_v7, %v218_v7 }
  0x9d   : > { %223 = vadd.xlane.f32.xlu0 %v222_v8  ;;  %v231_v11 = vadd.f32 %v230_v10, %v229_v9 }
  0xa5   : > { %232 = vadd.xlane.f32.xlu0 %v231_v11 }
 0x110   : > { %v224_v13 = vpop.xlane.xlu0 %223 }
 0x111   : > { %v225_v14 = vadd.f32 %v224_v13, %v221_v12 }
 0x113   : > { %227 = vst.msk [vmem:[%s409_s2] sm:$0xff] %vm226_vm3, %v225_v14 }
 0x118   : > { %v233_v16 = vpop.xlane.xlu0 %232 }
 0x11a   : > { %v228_v15 = vld [vmem:[%s409_s2] sm:$0xff] }
 0x11b   : > { %v234_v17 = vadd.f32 %v233_v16, %v228_v15 }
 0x11d   : > { %236 = vst.msk [vmem:[%s409_s2] sm:$0xff] %vm235_vm4, %v234_v17 }
 0x11e PF: > { %s12_s11 = sadd.s32 1, %s341_s11   ;;  %s410_s9 = smov %s337_s10 }
 0x11f   : > { %p9_p6 = scmp.ge.s32.totalorder %s12_s11, 4   ;;  %s411_s10 = smov %s413_s12 }
 0x121   :  { %11 = sbr.rel (!%p9_p6) target bundleno = 2 (0x2), region = 58 }

</bundles_post_ra>
